<compile_context>
chip_gen: v5e
topology: v5e:2x2
jax: 0.10.0
libtpu: 0.0.40
codegen_flags: <defaults>
</compile_context>

<pallas_src>
import jax
import jax.numpy as jnp
import numpy as np
from jax.experimental import pallas as pl
from jax.experimental.pallas import tpu as pltpu

# ---- problem sizes consistent with the module's forward ----
B, N, C = 2, 8, 32
NUM_HEADS = 4
HEAD_DIM = C // NUM_HEADS
SCALE = HEAD_DIM ** -0.5
NEG = -1e9     # finite "masked" value: exp(s - rowmax) underflows to 0, never NaN


def attention_kernel(x_ref, mask_ref, wqkv_ref, wproj_ref, bproj_ref, o_ref):
    BN = B * N
    x = x_ref[...]                                                     # (B*N, C)

    # One MXU push for all of Q/K/V (softmax scale pre-folded into the Q columns).
    qkv = jnp.dot(x, wqkv_ref[...], preferred_element_type=jnp.float32)  # (B*N, 3C)

    # lane -> sublane: gather per-head slices into (H*B*N, hd), rows ordered (h, b, n).
    def split_heads(base):
        return jnp.concatenate(
            [qkv[:, base + h * HEAD_DIM: base + (h + 1) * HEAD_DIM]
             for h in range(NUM_HEADS)], axis=0)                       # (H*B*N, hd)

    q = split_heads(0)          # scale already folded into these columns
    k = split_heads(C)
    v = split_heads(2 * C)

    # One score matmul over all heads/batches; block-diagonal mask keeps them apart.
    s = jax.lax.dot_general(q, k, (((1,), (1,)), ((), ())),
                            preferred_element_type=jnp.float32)        # (HBN, HBN)
    s = s + mask_ref[...]                                              # additive mask
    s = s - jnp.max(s, axis=-1, keepdims=True)
    p = jnp.exp(s)
    p = p / jnp.sum(p, axis=-1, keepdims=True)        # exact division (EUP idle anyway)

    o = jnp.dot(p, v, preferred_element_type=jnp.float32)              # (H*B*N, hd)

    # sublane -> lane: back to (B*N, C) with columns ordered (h, hd), as in the module.
    o2d = jnp.concatenate([o[h * BN:(h + 1) * BN, :] for h in range(NUM_HEADS)],
                          axis=1)                                      # (B*N, C)

    # Single lane-dense output projection + bias.
    o_ref[...] = (jnp.dot(o2d, wproj_ref[...], preferred_element_type=jnp.float32)
                  + bproj_ref[...]).astype(o_ref.dtype)


def _block_diag_mask(attn_mask, num_heads):
    """(B, N, N) additive mask -> (H*B*N, H*B*N) block-diagonal additive mask.

    Rows/cols are ordered (head, batch, position); off-diagonal blocks get -1e9.
    Built wrapper-side once (plain XLA ops, zero in-kernel cost).
    """
    Bx, Nx, _ = attn_mask.shape
    total = num_heads * Bx * Nx
    big = jnp.full((total, total), NEG, jnp.float32)
    for h in range(num_heads):
        for b in range(Bx):
            r = (h * Bx + b) * Nx
            big = jax.lax.dynamic_update_slice(
                big, attn_mask[b].astype(jnp.float32), (r, r))
    return big


def attention_forward(x, attn_mask, wqkv, wproj, bproj):
    """x: (B, N, C); attn_mask: (B, N, N) additive mask or None; weights in x @ W layout."""
    Bx, Nx, Cx = x.shape
    if attn_mask is None:
        attn_mask = jnp.zeros((Bx, Nx, Nx), jnp.float32)
    # TODO(synk): the module contract allows masks broadcastable to (B*num_heads, N, N);
    # only the head-shared (B, N, N) form is wired up here.
    assert attn_mask.shape == (Bx, Nx, Nx), "expected a head-shared (B, N, N) additive mask"

    # Wrapper-side re-layout (zero in-kernel cost): fold the 1/sqrt(hd) scale into
    # the Q columns of the fused QKV slab; build the (64, 64) block-diagonal mask.
    wqkv_scaled = jnp.concatenate([wqkv[:, :Cx] * SCALE, wqkv[:, Cx:]], axis=1)  # (C, 3C)
    mask_big = _block_diag_mask(attn_mask, NUM_HEADS)
    x2d = x.reshape(Bx * Nx, Cx)                                                 # fold batch

    vmem = pl.BlockSpec(memory_space=pltpu.MemorySpace.VMEM)
    out2d = pl.pallas_call(
        attention_kernel,
        out_shape=jax.ShapeDtypeStruct((Bx * Nx, Cx), x.dtype),
        in_specs=[vmem] * 5,
        out_specs=vmem,
    )(x2d, mask_big, wqkv_scaled, wproj, bproj)
    return out2d.reshape(Bx, Nx, Cx)


# ---------------- pure-JAX reference (mirrors the PyTorch forward) ----------------
def ref_attention(x, attn_mask, wqkv, wproj, bproj):
    Bx, Nx, Cx = x.shape
    qkv = (x @ wqkv).reshape(Bx, Nx, 3, NUM_HEADS, HEAD_DIM).transpose(2, 0, 3, 1, 4)
    q, k, v = qkv[0], qkv[1], qkv[2]                                   # (B, H, N, hd)
    s = (q * SCALE) @ jnp.swapaxes(k, -1, -2) + attn_mask[:, None, :, :]
    p = jax.nn.softmax(s, axis=-1)
    o = jnp.swapaxes(p @ v, 1, 2).reshape(Bx, Nx, Cx)
    return o @ wproj + bproj


if __name__ == "__main__":
    key = jax.random.PRNGKey(0)
    kx, kqkv, kproj, kb = jax.random.split(key, 4)

    x = jax.random.normal(kx, (B, N, C), jnp.float32)
    wqkv = 0.05 * jax.random.normal(kqkv, (C, 3 * C), jnp.float32)    # qkv_bias=False
    wproj = 0.05 * jax.random.normal(kproj, (C, C), jnp.float32)
    bproj = 0.02 * jax.random.normal(kb, (1, C), jnp.float32)

    # Additive causal attention mask, head-shared (broadcastable to (B*num_heads, N, N)).
    causal = jnp.tril(jnp.ones((N, N), jnp.bool_))
    attn_mask = jnp.where(causal, 0.0, NEG).astype(jnp.float32)
    attn_mask = jnp.broadcast_to(attn_mask, (B, N, N))

    out = jax.block_until_ready(attention_forward(x, attn_mask, wqkv, wproj, bproj))

    # High-precision reference; tolerance covers f32 matmul rounding differences only
    # (the approx reciprocal is gone, softmax now uses exact division).
    with jax.default_matmul_precision("highest"):
        ref = ref_attention(x, attn_mask, wqkv, wproj, bproj)

    np.testing.assert_allclose(np.asarray(out), np.asarray(ref), rtol=2e-3, atol=2e-3)

    print("KERNEL_OK")
</pallas_src>

<mosaic_0001>
module attributes {stable_mosaic.version = 11 : i64} {
  func.func @attention_kernel(%arg0: memref<16x32xf32, #tpu.memory_space<vmem>>, %arg1: memref<64x64xf32, #tpu.memory_space<vmem>>, %arg2: memref<32x96xf32, #tpu.memory_space<vmem>>, %arg3: memref<32x32xf32, #tpu.memory_space<vmem>>, %arg4: memref<1x32xf32, #tpu.memory_space<vmem>>, %arg5: memref<16x32xf32, #tpu.memory_space<vmem>>) attributes {dimension_semantics = [], scalar_prefetch = 0 : i64, scratch_operands = 0 : i64, tpu.core_type = #tpu.core_type<tc>} {
    %c0 = arith.constant 0 : index
    %c0_0 = arith.constant 0 : index
    %0 = vector.load %arg0[%c0, %c0_0] : memref<16x32xf32, #tpu.memory_space<vmem>>, vector<16x32xf32>
    %c0_1 = arith.constant 0 : index
    %c0_2 = arith.constant 0 : index
    %1 = vector.load %arg2[%c0_1, %c0_2] : memref<32x96xf32, #tpu.memory_space<vmem>>, vector<32x96xf32>
    %cst = arith.constant dense<0.000000e+00> : vector<16x96xf32>
    %2 = tpu.matmul %0, %1, %cst {dimension_numbers = #tpu.dot_dimension_numbers<[1], [0], [0], [1], [0, 0, 1, 1], [], []>} : vector<16x32xf32>, vector<32x96xf32>, vector<16x96xf32> -> vector<16x96xf32>
    %3 = vector.extract_strided_slice %2 {offsets = [0, 0], sizes = [16, 8], strides = [1, 1]} : vector<16x96xf32> to vector<16x8xf32>
    %4 = vector.extract_strided_slice %2 {offsets = [0, 8], sizes = [16, 8], strides = [1, 1]} : vector<16x96xf32> to vector<16x8xf32>
    %5 = vector.extract_strided_slice %2 {offsets = [0, 16], sizes = [16, 8], strides = [1, 1]} : vector<16x96xf32> to vector<16x8xf32>
    %6 = vector.extract_strided_slice %2 {offsets = [0, 24], sizes = [16, 8], strides = [1, 1]} : vector<16x96xf32> to vector<16x8xf32>
    %7 = tpu.concatenate %3, %4, %5, %6 in 0 : vector<16x8xf32>, vector<16x8xf32>, vector<16x8xf32>, vector<16x8xf32> -> vector<64x8xf32>
    %8 = vector.extract_strided_slice %2 {offsets = [0, 32], sizes = [16, 8], strides = [1, 1]} : vector<16x96xf32> to vector<16x8xf32>
    %9 = vector.extract_strided_slice %2 {offsets = [0, 40], sizes = [16, 8], strides = [1, 1]} : vector<16x96xf32> to vector<16x8xf32>
    %10 = vector.extract_strided_slice %2 {offsets = [0, 48], sizes = [16, 8], strides = [1, 1]} : vector<16x96xf32> to vector<16x8xf32>
    %11 = vector.extract_strided_slice %2 {offsets = [0, 56], sizes = [16, 8], strides = [1, 1]} : vector<16x96xf32> to vector<16x8xf32>
    %12 = tpu.concatenate %8, %9, %10, %11 in 0 : vector<16x8xf32>, vector<16x8xf32>, vector<16x8xf32>, vector<16x8xf32> -> vector<64x8xf32>
    %13 = vector.extract_strided_slice %2 {offsets = [0, 64], sizes = [16, 8], strides = [1, 1]} : vector<16x96xf32> to vector<16x8xf32>
    %14 = vector.extract_strided_slice %2 {offsets = [0, 72], sizes = [16, 8], strides = [1, 1]} : vector<16x96xf32> to vector<16x8xf32>
    %15 = vector.extract_strided_slice %2 {offsets = [0, 80], sizes = [16, 8], strides = [1, 1]} : vector<16x96xf32> to vector<16x8xf32>
    %16 = vector.extract_strided_slice %2 {offsets = [0, 88], sizes = [16, 8], strides = [1, 1]} : vector<16x96xf32> to vector<16x8xf32>
    %17 = tpu.concatenate %13, %14, %15, %16 in 0 : vector<16x8xf32>, vector<16x8xf32>, vector<16x8xf32>, vector<16x8xf32> -> vector<64x8xf32>
    %cst_3 = arith.constant dense<0.000000e+00> : vector<64x64xf32>
    %18 = tpu.matmul %7, %12, %cst_3 {dimension_numbers = #tpu.dot_dimension_numbers<[1], [1], [0], [0], [0, 0, 1, 0], [], []>} : vector<64x8xf32>, vector<64x8xf32>, vector<64x64xf32> -> vector<64x64xf32>
    %c0_4 = arith.constant 0 : index
    %c0_5 = arith.constant 0 : index
    %19 = vector.load %arg1[%c0_4, %c0_5] : memref<64x64xf32, #tpu.memory_space<vmem>>, vector<64x64xf32>
    %20 = arith.addf %18, %19 : vector<64x64xf32>
    %cst_6 = arith.constant dense<0xFF800000> : vector<64xf32>
    %21 = vector.multi_reduction <maximumf>, %20, %cst_6 [1] : vector<64x64xf32> to vector<64xf32>
    %22 = vector.shape_cast %21 : vector<64xf32> to vector<64x1xf32>
    %23 = vector.broadcast %22 : vector<64x1xf32> to vector<64x64xf32>
    %24 = arith.subf %20, %23 : vector<64x64xf32>
    %25 = math.exp %24 : vector<64x64xf32>
    %cst_7 = arith.constant dense<0.000000e+00> : vector<64xf32>
    %26 = vector.multi_reduction <add>, %25, %cst_7 [1] : vector<64x64xf32> to vector<64xf32>
    %27 = vector.shape_cast %26 : vector<64xf32> to vector<64x1xf32>
    %28 = vector.broadcast %27 : vector<64x1xf32> to vector<64x64xf32>
    %29 = arith.divf %25, %28 : vector<64x64xf32>
    %cst_8 = arith.constant dense<0.000000e+00> : vector<64x8xf32>
    %30 = tpu.matmul %29, %17, %cst_8 {dimension_numbers = #tpu.dot_dimension_numbers<[1], [0], [0], [1], [0, 0, 1, 1], [], []>} : vector<64x64xf32>, vector<64x8xf32>, vector<64x8xf32> -> vector<64x8xf32>
    %31 = vector.extract_strided_slice %30 {offsets = [0, 0], sizes = [16, 8], strides = [1, 1]} : vector<64x8xf32> to vector<16x8xf32>
    %32 = vector.extract_strided_slice %30 {offsets = [16, 0], sizes = [16, 8], strides = [1, 1]} : vector<64x8xf32> to vector<16x8xf32>
    %33 = vector.extract_strided_slice %30 {offsets = [32, 0], sizes = [16, 8], strides = [1, 1]} : vector<64x8xf32> to vector<16x8xf32>
    %34 = vector.extract_strided_slice %30 {offsets = [48, 0], sizes = [16, 8], strides = [1, 1]} : vector<64x8xf32> to vector<16x8xf32>
    %35 = tpu.concatenate %31, %32, %33, %34 in 1 : vector<16x8xf32>, vector<16x8xf32>, vector<16x8xf32>, vector<16x8xf32> -> vector<16x32xf32>
    %c0_9 = arith.constant 0 : index
    %c0_10 = arith.constant 0 : index
    %36 = vector.load %arg3[%c0_9, %c0_10] : memref<32x32xf32, #tpu.memory_space<vmem>>, vector<32x32xf32>
    %cst_11 = arith.constant dense<0.000000e+00> : vector<16x32xf32>
    %37 = tpu.matmul %35, %36, %cst_11 {dimension_numbers = #tpu.dot_dimension_numbers<[1], [0], [0], [1], [0, 0, 1, 1], [], []>} : vector<16x32xf32>, vector<32x32xf32>, vector<16x32xf32> -> vector<16x32xf32>
    %c0_12 = arith.constant 0 : index
    %c0_13 = arith.constant 0 : index
    %38 = vector.load %arg4[%c0_12, %c0_13] : memref<1x32xf32, #tpu.memory_space<vmem>>, vector<1x32xf32>
    %39 = vector.broadcast %38 : vector<1x32xf32> to vector<16x32xf32>
    %40 = arith.addf %37, %39 : vector<16x32xf32>
    %c0_14 = arith.constant 0 : index
    %c0_15 = arith.constant 0 : index
    %41 = vector.load %arg5[%c0_14, %c0_15] : memref<16x32xf32, #tpu.memory_space<vmem>>, vector<16x32xf32>
    tpu.vector_store %arg5[%c0_14, %c0_15], %40 {strides = array<i32>} : memref<16x32xf32, #tpu.memory_space<vmem>>, vector<16x32xf32>,
    return
  }
}

</mosaic_0001>

<bundles_post_ra>
// kernel: tpu_custom_call.1
= control target key start
LH: loop header
LB: loop body
LE: loop exit
PB: predicated region body
PF: predicated region fallthrough
CT: control target
= control target key end

     0   :  { %10 = vsyncpa [#allocation3], 0  ;;  %s1091_s0 = inlined_call_operand.hbm [shape: f32[16,32], index: 0, kind: input, shape index: {}]   ;;  %s1092_s1 = inlined_call_operand.hbm [shape: f32[64,64], index: 1, kind: input, shape index: {}]   ;;  %s1093_s2 = inlined_call_operand.hbm [shape: f32[32,96], index: 2, kind: input, shape index: {}]   ;;  %s1094_s3 = inlined_call_operand.hbm [shape: f32[32,32], index: 3, kind: input, shape index: {}]   ;;  %s1095_s4 = inlined_call_operand.vmem [shape: f32[1,32], index: 4, kind: input, shape index: {}]   ;;  %s1096_s5 = inlined_call_operand.hbm [shape: f32[16,32], index: 5, kind: output, shape index: {}]  }
   0x1   :  { %11 = vsyncpa [#allocation6], 0 }
   0x2   :  { %12 = vsyncpa [#allocation9], 0 }
   0x3   :  { %13 = vsyncpa [#allocation4], 0  ;;  %s31_s20 = sshll.u32 %s1092_s1, 4  ;;  %s845_s21 = smov [#allocation5]   ;;  %s32_s20 = int_to_ptr.hbm [resolvable:$true] %s31_s20 }
   0x4   :  { %s33_s22 = sshll.u32 %s845_s21, 4  ;;  %s18_s25 = sshll.u32 %s1091_s0, 4  ;;  %s34_s22 = int_to_ptr.vmem [resolvable:$true] %s33_s22  ;;  %s19_s25 = int_to_ptr.hbm [resolvable:$true] %s18_s25 }
   0x5   :  { %s846_s26 = smov 128   ;;  %s847_s27 = smov 8  }
   0x6   :  { %39 = dma.hbm_to_vmem [thread:$0]  %s32_s20, 1024, %s34_s22, [#allocation6], %s846_s26, %s846_s26, %s847_s27  }
   0x7   :  { %s848_s28 = smov [#allocation2]   ;;  %s44_s1 = sshll.u32 %s1093_s2, 4  ;;  %s45_s1 = int_to_ptr.hbm [resolvable:$true] %s44_s1 }
   0x8   :  { %s20_s29 = sshll.u32 %s848_s28, 4  ;;  %s57_s8 = sshll.u32 %s1094_s3, 4  ;;  %s21_s29 = int_to_ptr.vmem [resolvable:$true] %s20_s29  ;;  %s58_s8 = int_to_ptr.hbm [resolvable:$true] %s57_s8 }
   0x9   :  { %26 = dma.hbm_to_vmem [thread:$0]  %s19_s25, 256, %s21_s29, [#allocation3], %s846_s26, %s846_s26, %s847_s27  }
   0xa   :  { %s849_s9 = smov [#allocation7]   ;;  %s850_s11 = smov [#allocation8]  }
   0xb   :  { %s46_s10 = sshll.u32 %s849_s9, 4  ;;  %s59_s2 = sshll.u32 %s850_s11, 4  ;;  %s47_s10 = int_to_ptr.vmem [resolvable:$true] %s46_s10  ;;  %s60_s2 = int_to_ptr.vmem [resolvable:$true] %s59_s2 }
   0xc   :  { %52 = dma.hbm_to_vmem [thread:$0]  %s45_s1, 512, %s47_s10, [#allocation6], %s846_s26, %s846_s26, %s847_s27  }
   0xd   :  { %65 = dma.hbm_to_vmem [thread:$0]  %s58_s8, 512, %s60_s2, [#allocation9], %s846_s26, %s846_s26, %s847_s27  }
   0xe   :  { %837 = dma.done.wait [#allocation3], 256  }
   0xf   :  { %838 = vsyncadd [#allocation3], 4294967040 }
  0x10   :  { %839 = dma.done.wait [#allocation6], 1536  }
  0x11   :  { %840 = vsyncadd [#allocation6], 4294965760 }
  0x12   :  { %841 = dma.done.wait [#allocation9], 512  }
  0x13   :  { %842 = vsyncadd [#allocation9], 4294966784  ;;  %v89_v0 = vld [vmem:[#allocation7 + $0x18] sm:$0xff]  ;;  %v88_v1 = vld [vmem:[#allocation7 + $0x10] sm:$0xff]  ;;  %vm90_vm0 = vcmask 261120   ;;  %s851_s3 = smov 120  }
  0x14   :  { %109 = vmatpush.msra.mxu3 %v89_v0  ;;  %v87_v2 = vld [vmem:[#allocation7 + $0x8] sm:$0xff]  ;;  %v86_v3 = vld [vmem:[#allocation7] sm:$0xff]  ;;  %v84_v4 = vld [vmem:[#allocation2] sm:$0xff]  ;;  %s852_s12 = smov 112   ;;  %s853_s13 = smov 104   ;;  %vm158_vm1 = vcmask 64512  }
  0x15   :  { %v85_v5 = vld [vmem:[#allocation2 + $0x8] sm:$0xff]  ;;  %s854_s14 = smov 96   ;;  %v134_v22 = vld [vmem:[#allocation5] sm:$0xff]  ;;  %vm232_vm2 = vcmask 523264   ;;  %v135_v28 = vld [vmem:[#allocation5 + $0x8] sm:$0xff]  ;;  %s855_s15 = smov 64  }
  0x16   :  { %110 = vmatpush.msra.mxu3 %v88_v1  ;;  %v138_v27 = vld [vmem:[#allocation5 + $0x20] sm:$0xff]  ;;  %v139_v29 = vld [vmem:[#allocation5 + $0x28] sm:$0xff]  ;;  %v136_v38 = vld [vmem:[#allocation5 + $0x10] sm:$0xff]  ;;  %s856_s16 = smov 24   ;;  %s857_s17 = smov 16  }
  0x17   :  { %v137_v43 = vld [vmem:[#allocation5 + $0x18] sm:$0xff]  ;;  %v140_v53 = vld [vmem:[#allocation5 + $0x30] sm:$0xff]  ;;  %s858_s20 = smov [#allocation10]   ;;  %s591_s24 = sshll.u32 %s1096_s5, 4  ;;  %s592_s24 = int_to_ptr.hbm [resolvable:$true] %s591_s24 }
  0x18   :  { %111 = vmatpush.msra.mxu3 %v87_v2  ;;  %v141_v47 = vld [vmem:[#allocation5 + $0x38] sm:$0xff]  ;;  %s589_s21 = sshll.u32 %s858_s20, 4  ;;  %s590_s21 = int_to_ptr.vmem [resolvable:$true] %s589_s21 }
  0x1a   :  { %112 = vmatpush.msra.mxu3 %v86_v3 }
  0x1b   :  { %606 = vmatmul.msk.f32.vlgmr.msra.gmra.mxu3 %vm90_vm0, %v84_v4 }
  0x23   :  { %607 = vmatmul.msk.f32.gmra.mxu3 %vm90_vm0, %v85_v5 }
  0x9e   :  { %v915_v6 = vpop.f32.mrf.mxu3 }
  0xa6   :  { %v917_v7 = vpop.f32.mrf.mxu3 }
  0xa7   :  { %124 = vrot.lane.b32.xlu2 %v917_v7, %s851_s3  ;;  %128 = vrot.lane.b32.xlu1 %v917_v7, %s852_s12 }
  0xa8   :  { %132 = vrot.lane.b32.xlu0 %v917_v7, %s853_s13 }
  0xaf   :  { %122 = vrot.lane.b32.xlu2 %v915_v6, %s851_s3  ;;  %126 = vrot.lane.b32.xlu1 %v915_v6, %s852_s12 }
  0xb0   :  { %130 = vrot.lane.b32.xlu0 %v915_v6, %s853_s13 }
 0x101   :  { %v925_v8 = vpop.permute.xlu2 %124 }
 0x109   :  { %v933_v11 = vpop.permute.xlu2 %122 }
 0x119   :  { %v927_v9 = vpop.permute.xlu1 %128 }
 0x11a   :  { %v929_v10 = vpop.permute.xlu0 %132  ;;  %152 = vrot.lane.b32.xlu2 %v927_v9, %s854_s14 }
 0x11b   :  { %156 = vrot.lane.b32.xlu0 %v929_v10, %s854_s14 }
 0x121   :  { %v935_v12 = vpop.permute.xlu1 %126 }
 0x122   :  { %v937_v13 = vpop.permute.xlu0 %130  ;;  %146 = vrot.lane.b32.xlu2 %v933_v11, %s854_s14  ;;  %v669_v49 = vpack.i.bf16 %v935_v12, %v927_v9 }
 0x123   :  { %150 = vrot.lane.b32.xlu0 %v935_v12, %s854_s14  ;;  %154 = vrot.lane.b32.xlu1 %v937_v13, %s854_s14  ;;  %v664_v52 = vpack.i.bf16 %v937_v13, %v929_v10 }
 0x12b   :  { %144 = vrot.lane.b32.xlu0 %v917_v7, %s854_s14  ;;  %148 = vrot.lane.b32.xlu1 %v925_v8, %s854_s14 }
 0x133   :  { %142 = vrot.lane.b32.xlu1 %v915_v6, %s854_s14 }
 0x174   :  { %v153_v16 = vpop.permute.xlu2 %152 }
 0x17c   :  { %v147_v19 = vpop.permute.xlu2 %146 }
 0x18d   :  { %v157_v14 = vpop.permute.xlu0 %156 }
 0x18e   :  { %608 = vmatpush.xpose.msk.msra.mxu0 %vm158_vm1, %v157_v14  ;;  %634 = vmatpush.xpose.msk.msra.mxu1 %vm158_vm1, %v157_v14 }
 0x195   :  { %v155_v15 = vpop.permute.xlu1 %154  ;;  %v151_v17 = vpop.permute.xlu0 %150 }
 0x196   :  { %609 = vmatpush.xpose.msk.msra.mxu0 %vm158_vm1, %v155_v15  ;;  %635 = vmatpush.xpose.msk.msra.mxu1 %vm158_vm1, %v155_v15 }
 0x19a   :  { %610 = vmatpush.xpose.msk.msra.mxu0 %vm158_vm1, %v153_v16  ;;  %636 = vmatpush.xpose.msk.msra.mxu1 %vm158_vm1, %v153_v16 }
 0x19d   :  { %v149_v18 = vpop.permute.xlu1 %148  ;;  %v145_v20 = vpop.permute.xlu0 %144 }
 0x19e   :  { %611 = vmatpush.xpose.msk.msra.mxu0 %vm158_vm1, %v151_v17  ;;  %637 = vmatpush.xpose.msk.msra.mxu1 %vm158_vm1, %v151_v17  ;;  %v674_v17 = vpack.i.bf16 %v933_v11, %v925_v8 }
 0x1a2   :  { %612 = vmatpush.xpose.msk.msra.mxu0 %vm158_vm1, %v149_v18  ;;  %638 = vmatpush.xpose.msk.msra.mxu1 %vm158_vm1, %v149_v18 }
 0x1a5   :  { %v143_v21 = vpop.permute.xlu1 %142 }
 0x1a6   :  { %613 = vmatpush.xpose.msk.msra.mxu0 %vm158_vm1, %v147_v19  ;;  %639 = vmatpush.xpose.msk.msra.mxu1 %vm158_vm1, %v147_v19 }
 0x1aa   :  { %614 = vmatpush.xpose.msk.msra.mxu0 %vm158_vm1, %v145_v20  ;;  %640 = vmatpush.xpose.msk.msra.mxu1 %vm158_vm1, %v145_v20 }
 0x1ae   :  { %615 = vmatpush.xpose.msk.msra.mxu0 %vm158_vm1, %v143_v21  ;;  %641 = vmatpush.xpose.msk.msra.mxu1 %vm158_vm1, %v143_v21 }
 0x1b1   :  { %616 = vmatmul.msk.f32.vlgmr.msra.gmra.mxu0 %vm158_vm1, %v915_v6  ;;  %620 = vmatmul.msk.f32.vlgmr.msra.gmra.mxu1 %vm158_vm1, %v935_v12  ;;  %v679_v12 = vpack.i.bf16 %v915_v6, %v917_v7 }
 0x1b9   :  { %617 = vmatmul.msk.f32.gmra.mxu0 %vm158_vm1, %v917_v7  ;;  %621 = vmatmul.msk.f32.gmra.mxu1 %vm158_vm1, %v927_v9 }
 0x1c1   :  { %618 = vmatmul.msk.f32.gmra.mxu0 %vm158_vm1, %v933_v11  ;;  %622 = vmatmul.msk.f32.gmra.mxu1 %vm158_vm1, %v937_v13 }
 0x1c9   :  { %619 = vmatmul.msk.f32.gmra.mxu0 %vm158_vm1, %v925_v8  ;;  %623 = vmatmul.msk.f32.gmra.mxu1 %vm158_vm1, %v929_v10 }
 0x22e   :  { %v208_v23 = vpop.f32.mrf.mxu0  ;;  %v220_v24 = vpop.f32.mrf.mxu1 }
 0x22f   :  { %v209_v25 = vadd.f32 %v208_v23, %v134_v22  ;;  %v978_v30 = vadd.f32 %v220_v24, %v138_v27 }
 0x231   :  { %v233_v26 = vsel %vm232_vm2, %v209_v25, -inf  ;;  %v245_v37 = vsel %vm232_vm2, %v978_v30, -inf }
 0x232   :  { %234 = vmax.xlane.f32.xlu2 %v233_v26 }
 0x236   :  { %v211_v31 = vpop.f32.mrf.mxu0  ;;  %v223_v32 = vpop.f32.mrf.mxu1 }
 0x237   :  { %v212_v33 = vadd.f32 %v211_v31, %v135_v28  ;;  %v980_v34 = vadd.f32 %v223_v32, %v139_v29 }
 0x239   :  { %v248_v35 = vsel %vm232_vm2, %v980_v34, -inf  ;;  %v236_v36 = vsel %vm232_vm2, %v212_v33, -inf }
 0x23a   :  { %249 = vmax.xlane.f32.xlu1 %v248_v35  ;;  %237 = vmax.xlane.f32.xlu0 %v236_v36 }
 0x23b   :  { %246 = vmax.xlane.f32.xlu2 %v245_v37 }
 0x23e   :  { %v214_v39 = vpop.f32.mrf.mxu0  ;;  %v226_v41 = vpop.f32.mrf.mxu1 }
 0x23f   :  { %v215_v40 = vadd.f32 %v214_v39, %v136_v38  ;;  %v227_v54 = vadd.f32 %v226_v41, %v140_v53 }
 0x241   :  { %v239_v42 = vsel %vm232_vm2, %v215_v40, -inf  ;;  %v251_v55 = vsel %vm232_vm2, %v227_v54, -inf }
 0x242   :  { %240 = vmax.xlane.f32.xlu1 %v239_v42 }
 0x246   :  { %v217_v44 = vpop.f32.mrf.mxu0  ;;  %v229_v48 = vpop.f32.mrf.mxu1 }
 0x247   :  { %v218_v45 = vadd.f32 %v217_v44, %v137_v43  ;;  %v230_v50 = vadd.f32 %v229_v48, %v141_v47 }
 0x249   :  { %v242_v46 = vsel %vm232_vm2, %v218_v45, -inf  ;;  %v254_v51 = vsel %vm232_vm2, %v230_v50, -inf }
 0x24a   :  { %243 = vmax.xlane.f32.xlu2 %v242_v46 }
 0x24e   :  { %670 = vrot.lane.b32.xlu0 %v669_v49, %s855_s15 }
 0x252   :  { %255 = vmax.xlane.f32.xlu2 %v254_v51 }
 0x25b   :  { %665 = vrot.lane.b32.xlu1 %v664_v52, %s855_s15 }
 0x278   :  { %252 = vmax.xlane.f32.xlu0 %v251_v55 }
 0x2a5   :  { %v235_v56 = vpop.xlane.xlu2 %234 }
 0x2a6   :  { %v257_v57 = vsub.f32 %v209_v25, %v235_v56 }
 0x2a8   :  { %v265_v58 = vmul.f32 1.442695, %v257_v57 }
 0x2aa   :  { %685 = vpow2.f32 %v265_v58 }
 0x2ad   :  { %v250_v59 = vpop.xlane.xlu1 %249  ;;  %v238_v60 = vpop.xlane.xlu0 %237 }
 0x2ae   :  { %v258_v61 = vsub.f32 %v212_v33, %v238_v60  ;;  %v247_v18 = vpop.xlane.xlu2 %246  ;;  %v262_v27 = vsub.f32 %v980_v34, %v250_v59 }
 0x2af   :  { %v261_v24 = vsub.f32 %v978_v30, %v247_v18 }
 0x2b0   :  { %v997_v62 = vpop.eup %685  ;;  %v267_v63 = vmul.f32 1.442695, %v258_v61  ;;  %v275_v32 = vmul.f32 1.442695, %v262_v27 }
 0x2b1   :  { %v281_v0 = vsel %vm232_vm2, %v997_v62, 0.0  ;;  %v273_v28 = vmul.f32 1.442695, %v261_v24 }
 0x2b2   :  { %282 = vadd.xlane.f32.xlu0 %v281_v0  ;;  %687 = vpow2.f32 %v267_v63 }
 0x2b5   :  { %v241_v1 = vpop.xlane.xlu1 %240 }
 0x2b6   :  { %v259_v2 = vsub.f32 %v215_v40, %v241_v1 }
 0x2b8   :  { %v269_v3 = vmul.f32 1.442695, %v259_v2  ;;  %v1001_v4 = vpop.eup %687 }
 0x2b9   :  { %v284_v5 = vsel %vm232_vm2, %v1001_v4, 0.0 }
 0x2ba   :  { %689 = vpow2.f32 %v269_v3  ;;  %285 = vadd.xlane.f32.xlu2 %v284_v5 }
 0x2bd   :  { %v244_v7 = vpop.xlane.xlu2 %243 }
 0x2be   :  { %v260_v20 = vsub.f32 %v218_v45, %v244_v7 }
 0x2c0   :  { %v1005_v9 = vpop.eup %689  ;;  %v671_v15 = vpop.permute.xlu0 %670  ;;  %v271_v21 = vmul.f32 1.442695, %v260_v20 }
 0x2c1   :  { %v287_v10 = vsel %vm232_vm2, %v1005_v9, 0.0  ;;  %v672_v19 = vunpack.i.l.bf16 %v671_v15  ;;  %v673_v6 = vunpack.i.h.bf16 %v671_v15 }
 0x2c2   :  { %288 = vadd.xlane.f32.xlu1 %v287_v10  ;;  %691 = vpow2.f32 %v271_v21 }
 0x2c5   :  { %v256_v22 = vpop.xlane.xlu2 %255 }
 0x2c6   :  { %680 = vrot.lane.b32.xlu0 %v679_v12, %s855_s15  ;;  %v264_v23 = vsub.f32 %v230_v50, %v256_v22 }
 0x2c8   :  { %v279_v8 = vmul.f32 1.442695, %v264_v23  ;;  %v1016_v25 = vpop.eup %691 }
 0x2c9   :  { %v290_v31 = vsel %vm232_vm2, %v1016_v25, 0.0 }
 0x2ca   :  { %693 = vpow2.f32 %v279_v8 }
 0x2cd   :  { %v666_v13 = vpop.permute.xlu1 %665 }
 0x2ce   :  { %v667_v14 = vunpack.i.l.bf16 %v666_v13  ;;  %v668_v16 = vunpack.i.h.bf16 %v666_v13 }
 0x2d0   :  { %481 = vmatpush.msra.mxu2 %v667_v14  ;;  %642 = vmatpush.msrb.mxu3 %v667_v14  ;;  %v1021_v33 = vpop.eup %693 }
 0x2d1   :  { %v302_v34 = vsel %vm232_vm2, %v1021_v33, 0.0 }
 0x2d2   :  { %482 = vmatpush.msra.mxu2 %v668_v16  ;;  %643 = vmatpush.msrb.mxu3 %v668_v16 }
 0x2d3   :  { %675 = vrot.lane.b32.xlu2 %v674_v17, %s855_s15 }
 0x2d4   :  { %483 = vmatpush.msra.mxu2 %v672_v19  ;;  %644 = vmatpush.msrb.mxu3 %v672_v19 }
 0x2d6   :  { %484 = vmatpush.msra.mxu2 %v673_v6  ;;  %645 = vmatpush.msrb.mxu3 %v673_v6 }
 0x2eb   :  { %v253_v11 = vpop.xlane.xlu0 %252 }
 0x2ec   :  { %v263_v26 = vsub.f32 %v227_v54, %v253_v11 }
 0x2ee   :  { %v277_v29 = vmul.f32 1.442695, %v263_v26 }
 0x2f0   :  { %695 = vpow2.f32 %v277_v29  ;;  %291 = vadd.xlane.f32.xlu0 %v290_v31 }
 0x2f1   :  { %697 = vpow2.f32 %v273_v28 }
 0x2f2   :  { %699 = vpow2.f32 %v275_v32 }
 0x2f6   :  { %v1023_v30 = vpop.eup %695 }
 0x2f7   :  { %v299_v35 = vsel %vm232_vm2, %v1023_v30, 0.0  ;;  %v1029_v36 = vpop.eup %697 }
 0x2f8   :  { %300 = vadd.xlane.f32.xlu1 %v299_v35  ;;  %303 = vadd.xlane.f32.xlu0 %v302_v34  ;;  %v293_v37 = vsel %vm232_vm2, %v1029_v36, 0.0  ;;  %v1033_v38 = vpop.eup %699 }
 0x2f9   :  { %v296_v39 = vsel %vm232_vm2, %v1033_v38, 0.0 }
 0x2fc   :  { %294 = vadd.xlane.f32.xlu2 %v293_v37 }
 0x300   :  { %297 = vadd.xlane.f32.xlu1 %v296_v39 }
 0x325   :  { %v283_v40 = vpop.xlane.xlu0 %282 }
 0x326   :  { %701 = vrcp.f32 %v283_v40  ;;  %v316_v48 = vand.u32 2147483648, %v283_v40  ;;  %vm310_vm4 = vweird.f32 %v283_v40  ;;  %v314_v52 = vand.u32 2147483647, %v283_v40 }
 0x328   :  { %v317_v57 = vor.u32 1.1754944e-38, %v316_v48  ;;  %vm315_vm6 = vcmp.eq.f32.partialorder %v314_v52, 8.507059e+37 }
 0x32c   :  { %v702_v41 = vpop.eup %701 }
 0x32d   :  { %v306_v42 = vmul.f32 %v702_v41, %v283_v40  ;;  %v286_v43 = vpop.xlane.xlu2 %285  ;;  %vm311_vm3 = vweird.f32 %v702_v41 }
 0x32e   :  { %703 = vrcp.f32 %v286_v43  ;;  %vm312_vm5 = vmor %vm310_vm4, %vm311_vm3  ;;  %v331_v1 = vand.u32 2147483648, %v286_v43  ;;  %vm325_vm8 = vweird.f32 %v286_v43  ;;  %v329_v10 = vand.u32 2147483647, %v286_v43 }
 0x32f   :  { %v307_v44 = vsub.f32 1.0, %v306_v42 }
 0x330   :  { %v332_v14 = vor.u32 1.1754944e-38, %v331_v1  ;;  %vm330_vm10 = vcmp.eq.f32.partialorder %v329_v10, 8.507059e+37 }
 0x331   :  { %v308_v45 = vmul.f32 %v702_v41, %v307_v44 }
 0x333   :  { %v309_v46 = vadd.f32 %v702_v41, %v308_v45 }
 0x334   :  { %v704_v47 = vpop.eup %703 }
 0x335   :  { %v289_v49 = vpop.xlane.xlu1 %288  ;;  %v321_v50 = vmul.f32 %v704_v47, %v286_v43  ;;  %v676_v51 = vpop.permute.xlu2 %675  ;;  %v313_v56 = vsel %vm312_vm5, %v702_v41, %v309_v46  ;;  %vm326_vm7 = vweird.f32 %v704_v47 }
 0x336   :  { %705 = vrcp.f32 %v289_v49  ;;  %v677_v53 = vunpack.i.l.bf16 %v676_v51  ;;  %v678_v58 = vunpack.i.h.bf16 %v676_v51  ;;  %v318_v61 = vsel %vm315_vm6, %v317_v57, %v313_v56  ;;  %vm327_vm9 = vmor %vm325_vm8, %vm326_vm7 }
 0x337   :  { %v322_v54 = vsub.f32 1.0, %v321_v50  ;;  %v319_v5 = vmul.f32 %v997_v62, %v318_v61  ;;  %v346_v18 = vand.u32 2147483648, %v289_v49  ;;  %vm340_vm12 = vweird.f32 %v289_v49 }
 0x338   :  { %v681_v55 = vpop.permute.xlu0 %680  ;;  %485 = vmatpush.msra.mxu2 %v677_v53  ;;  %646 = vmatpush.msrb.mxu3 %v677_v53  ;;  %v344_v6 = vand.u32 2147483647, %v289_v49 }
 0x339   :  { %v682_v59 = vunpack.i.l.bf16 %v681_v55  ;;  %v323_v60 = vmul.f32 %v704_v47, %v322_v54  ;;  %v683_v3 = vunpack.i.h.bf16 %v681_v55  ;;  %v347_v7 = vor.u32 1.1754944e-38, %v346_v18 }
 0x33a   :  { %486 = vmatpush.msra.mxu2 %v678_v58  ;;  %647 = vmatpush.msrb.mxu3 %v678_v58  ;;  %vm345_vm14 = vcmp.eq.f32.partialorder %v344_v6, 8.507059e+37 }
 0x33b   :  { %v324_v0 = vadd.f32 %v704_v47, %v323_v60 }
 0x33c   :  { %v706_v63 = vpop.eup %705  ;;  %487 = vmatpush.msra.mxu2 %v682_v59  ;;  %648 = vmatpush.msrb.mxu3 %v682_v59 }
 0x33d   :  { %v336_v2 = vmul.f32 %v706_v63, %v289_v49  ;;  %v328_v13 = vsel %vm327_vm9, %v704_v47, %v324_v0  ;;  %vm341_vm11 = vweird.f32 %v706_v63 }
 0x33e   :  { %488 = vmatpush.msra.mxu2 %v683_v3  ;;  %649 = vmatpush.msrb.mxu3 %v683_v3  ;;  %v333_v16 = vsel %vm330_vm10, %v332_v14, %v328_v13  ;;  %vm342_vm13 = vmor %vm340_vm12, %vm341_vm11 }
 0x33f   :  { %v337_v12 = vsub.f32 1.0, %v336_v2  ;;  %624 = vmatmul.msk.f32.vlgmr.msra.gmra.mxu2 %vm232_vm2, %v319_v5  ;;  %v334_v19 = vmul.f32 %v1001_v4, %v333_v16 }
 0x341   :  { %v338_v15 = vmul.f32 %v706_v63, %v337_v12 }
 0x343   :  { %v339_v17 = vadd.f32 %v706_v63, %v338_v15 }
 0x345   :  { %v343_v62 = vsel %vm342_vm13, %v706_v63, %v339_v17 }
 0x346   :  { %v348_v20 = vsel %vm345_vm14, %v347_v7, %v343_v62 }
 0x347   :  { %625 = vmatmul.msk.f32.gmra.mxu2 %vm232_vm2, %v334_v19  ;;  %v349_v21 = vmul.f32 %v1005_v9, %v348_v20 }
 0x34f   :  { %626 = vmatmul.msk.f32.gmra.mxu2 %vm232_vm2, %v349_v21 }
 0x363   :  { %v292_v22 = vpop.xlane.xlu0 %291 }
 0x364   :  { %707 = vrcp.f32 %v292_v22  ;;  %v361_v27 = vand.u32 2147483648, %v292_v22  ;;  %v359_v29 = vand.u32 2147483647, %v292_v22  ;;  %vm355_vm3 = vweird.f32 %v292_v22 }
 0x366   :  { %v362_v35 = vor.u32 1.1754944e-38, %v361_v27  ;;  %vm360_vm5 = vcmp.eq.f32.partialorder %v359_v29, 8.507059e+37  ;;  %v547_v27 = vld [vmem:[#allocation8 + $0x8] sm:$0xff] }
 0x36a   :  { %v708_v23 = vpop.eup %707 }
 0x36b   :  { %v351_v24 = vmul.f32 %v708_v23, %v292_v22  ;;  %v301_v8 = vpop.xlane.xlu1 %300  ;;  %v1043_v11 = vpop.xlane.xlu0 %303  ;;  %vm356_vm15 = vweird.f32 %v708_v23 }
 0x36c   :  { %709 = vrcp.f32 %v301_v8  ;;  %vm357_vm4 = vmor %vm355_vm3, %vm356_vm15  ;;  %v404_v42 = vand.u32 2147483647, %v301_v8  ;;  %v406_v43 = vand.u32 2147483648, %v301_v8  ;;  %vm400_vm7 = vweird.f32 %v301_v8 }
 0x36d   :  { %v352_v4 = vsub.f32 1.0, %v351_v24  ;;  %711 = vrcp.f32 %v1043_v11  ;;  %vm415_vm12 = vweird.f32 %v1043_v11  ;;  %v421_v60 = vand.u32 2147483648, %v1043_v11 }
 0x36e   :  { %vm405_vm8 = vcmp.eq.f32.partialorder %v404_v42, 8.507059e+37  ;;  %v407_v52 = vor.u32 1.1754944e-38, %v406_v43  ;;  %v419_v63 = vand.u32 2147483647, %v1043_v11 }
 0x36f   :  { %v353_v26 = vmul.f32 %v708_v23, %v352_v4  ;;  %v295_v28 = vpop.xlane.xlu2 %294  ;;  %v422_v14 = vor.u32 1.1754944e-38, %v421_v60 }
 0x370   :  { %713 = vrcp.f32 %v295_v28  ;;  %v376_v55 = vand.u32 2147483648, %v295_v28  ;;  %v374_v56 = vand.u32 2147483647, %v295_v28  ;;  %vm370_vm13 = vweird.f32 %v295_v28 }
 0x371   :  { %v354_v9 = vadd.f32 %v708_v23, %v353_v26  ;;  %v548_v26 = vld [vmem:[#allocation8 + $0x10] sm:$0xff] }
 0x372   :  { %v710_v31 = vpop.eup %709  ;;  %v377_v5 = vor.u32 1.1754944e-38, %v376_v55  ;;  %vm375_vm3 = vcmp.eq.f32.partialorder %v374_v56, 8.507059e+37 }
 0x373   :  { %v712_v32 = vpop.eup %711  ;;  %v396_v34 = vmul.f32 %v710_v31, %v301_v8  ;;  %v1046_v37 = vpop.xlane.xlu1 %297  ;;  %v358_v39 = vsel %vm357_vm4, %v708_v23, %v354_v9  ;;  %vm401_vm6 = vweird.f32 %v710_v31 }
 0x374   :  { %v411_v40 = vmul.f32 %v712_v32, %v1043_v11  ;;  %715 = vrcp.f32 %v1046_v37  ;;  %v363_v44 = vsel %vm360_vm5, %v362_v35, %v358_v39  ;;  %vm402_vm9 = vmor %vm400_vm7, %vm401_vm6  ;;  %vm416_vm11 = vweird.f32 %v712_v32 }
 0x375   :  { %v397_v41 = vsub.f32 1.0, %v396_v34  ;;  %v364_v47 = vmul.f32 %v1016_v25, %v363_v44  ;;  %vm1057_vm14 = vmor %vm415_vm12, %vm416_vm11  ;;  %vm420_vm5 = vcmp.eq.f32.partialorder %v419_v63, 8.507059e+37  ;;  %vm385_vm6 = vweird.f32 %v1046_v37  ;;  %v684_v44 = vld [vmem:[%s1095_s4] ss:$0 sm:$0xff] }
 0x376   :  { %v714_v45 = vpop.eup %713  ;;  %v412_v46 = vsub.f32 1.0, %v411_v40  ;;  %v389_v18 = vand.u32 2147483647, %v1046_v37 }
 0x377   :  { %v398_v48 = vmul.f32 %v710_v31, %v397_v41  ;;  %v366_v49 = vmul.f32 %v714_v45, %v295_v28  ;;  %627 = vmatmul.msk.f32.gmra.mxu2 %vm232_vm2, %v364_v47  ;;  %vm371_vm10 = vweird.f32 %v714_v45  ;;  %v546_v28 = vld [vmem:[#allocation8] sm:$0xff] }
 0x378   :  { %v413_v50 = vmul.f32 %v712_v32, %v412_v46  ;;  %vm372_vm15 = vmor %vm370_vm13, %vm371_vm10 }
 0x379   :  { %v399_v51 = vadd.f32 %v710_v31, %v398_v48  ;;  %v367_v53 = vsub.f32 1.0, %v366_v49 }
 0x37a   :  { %v716_v54 = vpop.eup %715  ;;  %v414_v59 = vadd.f32 %v712_v32, %v413_v50 }
 0x37b   :  { %v368_v57 = vmul.f32 %v714_v45, %v367_v53  ;;  %v381_v25 = vmul.f32 %v716_v54, %v1046_v37  ;;  %v403_v58 = vsel %vm402_vm9, %v710_v31, %v399_v51  ;;  %vm386_vm4 = vweird.f32 %v716_v54 }
 0x37c   :  { %v408_v61 = vsel %vm405_vm8, %v407_v52, %v403_v58  ;;  %v418_v13 = vsel %vm1057_vm14, %v712_v32, %v414_v59  ;;  %vm387_vm7 = vmor %vm385_vm6, %vm386_vm4  ;;  %vm390_vm8 = vcmp.eq.f32.partialorder %v389_v18, 8.507059e+37  ;;  %vm543_vm9 = vcmask 195584  }
 0x37d   :  { %v382_v0 = vsub.f32 1.0, %v381_v25  ;;  %v409_v1 = vmul.f32 %v1023_v30, %v408_v61  ;;  %v369_v2 = vadd.f32 %v714_v45, %v368_v57  ;;  %v391_v30 = vand.u32 2147483648, %v1046_v37 }
 0x37e   :  { %v423_v19 = vsel %vm420_vm5, %v422_v14, %v418_v13 }
 0x37f   :  { %v383_v10 = vmul.f32 %v716_v54, %v382_v0  ;;  %630 = vmatmul.msk.f32.vlgmr.msrb.gmra.mxu3 %vm232_vm2, %v409_v1  ;;  %v373_v12 = vsel %vm372_vm15, %v714_v45, %v369_v2  ;;  %v392_v62 = vor.u32 1.1754944e-38, %v391_v30  ;;  %v424_v7 = vmul.f32 %v1021_v33, %v423_v19 }
 0x380   :  { %v378_v15 = vsel %vm375_vm3, %v377_v5, %v373_v12 }
 0x381   :  { %v379_v16 = vmul.f32 %v1029_v36, %v378_v15  ;;  %v384_v17 = vadd.f32 %v716_v54, %v383_v10 }
 0x383   :  { %628 = vmatmul.msk.f32.gmra.mxu2 %vm232_vm2, %v379_v16  ;;  %v388_v6 = vsel %vm387_vm7, %v716_v54, %v384_v17 }
 0x384   :  { %v393_v20 = vsel %vm390_vm8, %v392_v62, %v388_v6 }
 0x385   :  { %v394_v21 = vmul.f32 %v1033_v38, %v393_v20  ;;  %v549_v38 = vld [vmem:[#allocation8 + $0x18] sm:$0xff] }
 0x386   :  { %572 = vmatpush.msra.mxu3 %v549_v38 }
 0x387   :  { %631 = vmatmul.msk.f32.gmra.mxu3 %vm232_vm2, %v424_v7 }
 0x388   :  { %573 = vmatpush.msra.mxu3 %v548_v26 }
 0x38a   :  { %574 = vmatpush.msra.mxu3 %v547_v27 }
 0x38b   :  { %629 = vmatmul.msk.f32.gmra.mxu2 %vm232_vm2, %v394_v21  ;;  %vm540_vm2 = vcmask 130048  }
 0x38c   :  { %575 = vmatpush.msra.mxu3 %v546_v28 }
 0x3c2   :  { %v490_v36 = vpop.f32.mrf.mxu2 }
 0x3ca   :  { %v493_v22 = vpop.f32.mrf.mxu2 }
 0x3d2   :  { %v496_v23 = vpop.f32.mrf.mxu2 }
 0x3d3   :  { %516 = vrot.lane.b32.xlu2 %v496_v23, %s847_s27 }
 0x3fa   :  { %v499_v24 = vpop.f32.mrf.mxu2 }
 0x3fb   :  { %518 = vrot.lane.b32.xlu2 %v499_v24, %s847_s27 }
 0x402   :  { %v508_v8 = vpop.f32.mrf.mxu3 }
 0x403   :  { %532 = vrot.lane.b32.xlu0 %v508_v8, %s856_s16 }
 0x406   :  { %v502_v33 = vpop.f32.mrf.mxu2 }
 0x407   :  { %524 = vrot.lane.b32.xlu1 %v502_v33, %s857_s17 }
 0x40a   :  { %v511_v11 = vpop.f32.mrf.mxu3 }
 0x40e   :  { %v505_v4 = vpop.f32.mrf.mxu2 }
 0x40f   :  { %534 = vrot.lane.b32.xlu1 %v511_v11, %s856_s16  ;;  %526 = vrot.lane.b32.xlu0 %v505_v4, %s857_s17 }
 0x42d   :  { %v517_v29 = vpop.permute.xlu2 %516 }
 0x42e   :  { %v538_v9 = vsel %vm158_vm1, %v490_v36, %v517_v29 }
 0x455   :  { %v519_v37 = vpop.permute.xlu2 %518 }
 0x456   :  { %v539_v39 = vsel %vm158_vm1, %v493_v22, %v519_v37 }
 0x475   :  { %v533_v31 = vpop.permute.xlu0 %532 }
 0x479   :  { %v525_v32 = vpop.permute.xlu1 %524 }
 0x47a   :  { %v541_v35 = vsel %vm540_vm2, %v538_v9, %v525_v32 }
 0x47b   :  { %v544_v34 = vsel %vm543_vm9, %v541_v35, %v533_v31 }
 0x47c   :  { %632 = vmatmul.msk.f32.vlgmr.msra.gmra.mxu3 %vm90_vm0, %v544_v34 }
 0x481   :  { %v535_v40 = vpop.permute.xlu1 %534  ;;  %v527_v41 = vpop.permute.xlu0 %526 }
 0x482   :  { %v542_v42 = vsel %vm540_vm2, %v539_v39, %v527_v41 }
 0x483   :  { %v545_v43 = vsel %vm543_vm9, %v542_v42, %v535_v40 }
 0x484   :  { %633 = vmatmul.msk.f32.gmra.mxu3 %vm90_vm0, %v545_v43 }
 0x4ff   :  { %v577_v45 = vpop.f32.mrf.mxu3 }
 0x500   :  { %v578_v46 = vadd.f32 %v684_v44, %v577_v45 }
 0x502   :  { %583 = vst.msk [vmem:[#allocation10] sm:$0xff] %vm90_vm0, %v578_v46 }
 0x507   :  { %v580_v47 = vpop.f32.mrf.mxu3 }
 0x508   :  { %v581_v48 = vadd.f32 %v684_v44, %v580_v47 }
 0x50a   :  { %584 = vst.msk [vmem:[#allocation10 + $0x8] sm:$0xff] %vm90_vm0, %v581_v48 }
 0x50b   :  { %597 = dma.vmem_to_hbm [thread:$0]  %s590_s21, 256, %s592_s24, [#allocation4], %s846_s26, %s846_s26, %s847_s27  }
 0x50c   :  { %843 = dma.done.wait [#allocation4], 256  }
 0x50d   :  { %844 = vsyncadd [#allocation4], 4294967040 }
 0x50e   :  { %602 = vsyncpa [#allocation3], 1 }
 0x50f   :  { %603 = vsyncpa [#allocation6], 1 }
 0x510   :  { %604 = vsyncpa [#allocation9], 1 }
 0x511   :  { %605 = vsyncpa [#allocation4], 1 }

</bundles_post_ra>
